<compile_context>
chip_gen: v6e
topology: v6e:2x2x1
jax: 0.10.0
libtpu: 0.0.40
codegen_flags: <defaults>
</compile_context>

<pallas_src>
import jax
import jax.numpy as jnp
from jax.experimental import pallas as pl
from jax.experimental.pallas import tpu as pltpu


# ---------------------------------------------------------------------------
# Kernel
# ---------------------------------------------------------------------------
def base_model_kernel(
    q_ref, t_ref,                         # [Bt, Dq], [Bt, Dt]     (input dtype, e.g. f32)
    wq_load_ref, wt_load_ref, b_load_ref, # [Dq, 2H], [Dt, 2H], [1, 2H]
    w_e1_ref, b_e1_ref,                   # [2H, 2E], [1, 2E]
    w_e2_ref, b_e2_ref,                   # [2E, 2E], [1, 2E]
    w_c1_ref, b_c1_ref,                   # [2E, C],  [1, C]
    w_c2_row_ref,                         # [1, C]                 (f32)
    b_c2_ref,                             # [1, 1]                 (f32, SMEM)
    out_ref,                              # [Bt, 1]                (f32)
):
    f32 = jnp.float32
    cdt = w_e1_ref.dtype  # matmul-operand compute dtype (bf16 or f32)

    # Inputs arrive in their native dtype; cast on the VPU (hidden under DMA).
    q = q_ref[...].astype(cdt)
    t = t_ref[...].astype(cdt)

    # ---- fused loading layers (both towers at once, output [Bt, 2H]) ----
    loaded = (
        jnp.dot(q, wq_load_ref[...], preferred_element_type=f32)
        + jnp.dot(t, wt_load_ref[...], preferred_element_type=f32)
        + b_load_ref[...]
    )

    # ---- fused embedding MLP layer 1 (block-diagonal), ReLU ----
    h = jnp.dot(loaded.astype(cdt), w_e1_ref[...], preferred_element_type=f32)
    h = jnp.maximum(h + b_e1_ref[...], 0.0)

    # ---- fused embedding MLP layer 2 (block-diagonal)  == concat(qe, te) ----
    emb = jnp.dot(h.astype(cdt), w_e2_ref[...], preferred_element_type=f32)
    emb = emb + b_e2_ref[...]

    # ---- classification head: Linear(2E -> C) + ReLU ----
    c = jnp.dot(emb.astype(cdt), w_c1_ref[...], preferred_element_type=f32)
    c = jnp.maximum(c + b_c1_ref[...], 0.0)

    # ---- Linear(C -> 1) as multiply + lane reduction, then sigmoid ----
    logit = (jnp.sum(c * w_c2_row_ref[...], axis=-1, keepdims=True)
             + b_c2_ref[0, 0])
    out_ref[...] = jax.nn.sigmoid(logit).astype(out_ref.dtype)


# ---------------------------------------------------------------------------
# Weight fusion (done once, outside the per-call path)
# ---------------------------------------------------------------------------
def fuse_params(params, compute_dtype):
    """Build block-diagonal / padded fused weights from the per-tower params."""
    (wql, bql, wtl, btl,
     wqe1, bqe1, wqe2, bqe2,
     wte1, bte1, wte2, bte2,
     wc1, bc1, wc2, bc2) = params
    f32 = jnp.float32
    Dq, H = wql.shape
    Dt, _ = wtl.shape
    E = wqe1.shape[1]

    # Loading: pad each tower's weight into [D, 2H]; off-blocks are exact zeros.
    wq_load = jnp.zeros((Dq, 2 * H), f32).at[:, :H].set(wql)
    wt_load = jnp.zeros((Dt, 2 * H), f32).at[:, H:].set(wtl)
    b_load = jnp.concatenate([bql, btl], axis=-1)                       # [1, 2H]

    # Embedding layer 1: blockdiag(wqe1, wte1)  [2H, 2E]
    w_e1 = jnp.zeros((2 * H, 2 * E), f32).at[:H, :E].set(wqe1).at[H:, E:].set(wte1)
    b_e1 = jnp.concatenate([bqe1, bte1], axis=-1)                       # [1, 2E]

    # Embedding layer 2: blockdiag(wqe2, wte2)  [2E, 2E]
    w_e2 = jnp.zeros((2 * E, 2 * E), f32).at[:E, :E].set(wqe2).at[E:, E:].set(wte2)
    b_e2 = jnp.concatenate([bqe2, bte2], axis=-1)                       # [1, 2E]

    cd = compute_dtype
    return (
        wq_load.astype(cd), wt_load.astype(cd), b_load.astype(f32),
        w_e1.astype(cd), b_e1.astype(f32),
        w_e2.astype(cd), b_e2.astype(f32),
        wc1.astype(cd), bc1.astype(f32),
        wc2.T.astype(f32),                                              # [1, C]
        bc2.astype(f32),                                                # [1, 1]  (SMEM)
    )


# ---------------------------------------------------------------------------
# Wrapper
# ---------------------------------------------------------------------------
def _round_up(x, m):
    return (x + m - 1) // m * m


def _pick_batch_tile(B, batch_tile):
    """Batch tile: multiple of 8, as large as batch_tile, but guaranteeing
    >= 2 grid steps whenever B allows it so the 'parallel' axis shards across
    both TensorCores on v7x."""
    if B <= 8:
        return B                      # full (tiny) batch, single step
    half = -(-B // 2)                 # cdiv(B, 2)
    return min(batch_tile, max(8, _round_up(half, 8)))


def _base_forward(query_vector, tuple_vector, fused, *, batch_tile):
    B, Dq = query_vector.shape
    Dt = tuple_vector.shape[1]
    (wq_load, wt_load, b_load, w_e1, b_e1, w_e2, b_e2,
     w_c1, b_c1, w_c2_row, b_c2) = fused

    bt = _pick_batch_tile(B, batch_tile)
    grid = (pl.cdiv(B, bt),)

    def const_spec(arr):
        # Constant block index -> DMA'd once, stays VMEM-resident across steps.
        return pl.BlockSpec(arr.shape, lambda i: (0, 0), memory_space=pltpu.VMEM)

    in_specs = [
        # Batch-tiled inputs. If the xprof trace ever shows exposed input DMA
        # at this tile size, add pipeline_mode=pl.Buffered(3) here.
        pl.BlockSpec((bt, Dq), lambda i: (i, 0), memory_space=pltpu.VMEM),
        pl.BlockSpec((bt, Dt), lambda i: (i, 0), memory_space=pltpu.VMEM),
        const_spec(wq_load), const_spec(wt_load), const_spec(b_load),
        const_spec(w_e1), const_spec(b_e1),
        const_spec(w_e2), const_spec(b_e2),
        const_spec(w_c1), const_spec(b_c1),
        const_spec(w_c2_row),
        pl.BlockSpec(memory_space=pltpu.SMEM),        # b_c2 scalar, whole array
    ]
    out_spec = pl.BlockSpec((bt, 1), lambda i: (i, 0), memory_space=pltpu.VMEM)

    return pl.pallas_call(
        base_model_kernel,
        out_shape=jax.ShapeDtypeStruct((B, 1), jnp.float32),
        grid=grid,
        in_specs=in_specs,
        out_specs=out_spec,
        compiler_params=pltpu.CompilerParams(
            dimension_semantics=("parallel",),  # batch tiles shard over TCs (v7x)
            # 48 MB: headroom for large batch tiles on v5e/v6e (128 MiB phys)
            # while staying safely under v7x's 64 MiB physical VMEM.
            vmem_limit_bytes=48 << 20,
        ),
    )(query_vector, tuple_vector,
      wq_load, wt_load, b_load, w_e1, b_e1, w_e2, b_e2,
      w_c1, b_c1, w_c2_row, b_c2)


def make_base_model(params, *, compute_dtype=jnp.bfloat16, batch_tile=4096):
    """Build a jitted forward function.

    All weight fusion (block-diagonal packing, transposes, dtype casts) happens
    exactly once here — nothing but the pallas_call runs on the per-call path.
    """
    batch_tile = max(8, _round_up(int(batch_tile), 8))
    fused = fuse_params(params, compute_dtype)

    @jax.jit
    def apply(query_vector, tuple_vector):
        return _base_forward(query_vector, tuple_vector, fused,
                             batch_tile=batch_tile)

    return apply


# ---------------------------------------------------------------------------
# Parameters / reference
# ---------------------------------------------------------------------------
def init_params(key, Dq, Dt, H, E, C):
    """Deterministic synthetic parameters (PyTorch-Linear-shaped, stored [in, out])."""
    ks = jax.random.split(key, 8)
    scale = 0.1

    def lin(k, din, dout):
        kw, kb = jax.random.split(k)
        w = scale * jax.random.normal(kw, (din, dout), jnp.float32)
        b = scale * jax.random.normal(kb, (1, dout), jnp.float32)
        return w, b

    wql, bql = lin(ks[0], Dq, H)       # query_loading
    wtl, btl = lin(ks[1], Dt, H)       # tuple_loading
    wqe1, bqe1 = lin(ks[2], H, E)      # query_embedding layer 1
    wqe2, bqe2 = lin(ks[3], E, E)      # query_embedding layer 2
    wte1, bte1 = lin(ks[4], H, E)      # tuple_embedding layer 1
    wte2, bte2 = lin(ks[5], E, E)      # tuple_embedding layer 2
    wc1, bc1 = lin(ks[6], 2 * E, C)    # classifier layer 1
    wc2, bc2 = lin(ks[7], C, 1)        # classifier layer 2
    return (wql, bql, wtl, btl,
            wqe1, bqe1, wqe2, bqe2,
            wte1, bte1, wte2, bte2,
            wc1, bc1, wc2, bc2)


def reference_forward(q, t, p):
    (wql, bql, wtl, btl,
     wqe1, bqe1, wqe2, bqe2,
     wte1, bte1, wte2, bte2,
     wc1, bc1, wc2, bc2) = p
    ql = q @ wql + bql
    tl = t @ wtl + btl
    qe = jnp.maximum(ql @ wqe1 + bqe1, 0.0) @ wqe2 + bqe2
    te = jnp.maximum(tl @ wte1 + bte1, 0.0) @ wte2 + bte2
    qt = jnp.concatenate([qe, te], axis=-1)
    ch = jnp.maximum(qt @ wc1 + bc1, 0.0)
    return jax.nn.sigmoid(ch @ wc2 + bc2)


# ---------------------------------------------------------------------------
# Test
# ---------------------------------------------------------------------------
if __name__ == "__main__":
    Dq, Dt, H, E, C = 32, 48, 32, 32, 32

    key = jax.random.PRNGKey(0)
    kp, kq1, kt1, kq2, kt2 = jax.random.split(key, 5)
    params = init_params(kp, Dq, Dt, H, E, C)

    # Weight fusion + jit happen once per model; the per-call path is just the
    # pallas_call (review: hoist fuse_params / casts out of the hot path).
    model_f32 = make_base_model(params, compute_dtype=jnp.float32)
    model_bf16 = make_base_model(params)   # bf16 MXU path (default)

    # B=8   -> single tile (tiny batch).
    # B=300 -> tile=152, 2 grid steps (megacore path) + ragged last tile.
    for B, kq, kt in ((8, kq1, kt1), (300, kq2, kt2)):
        q = jax.random.normal(kq, (B, Dq), jnp.float32)
        t = jax.random.normal(kt, (B, Dt), jnp.float32)
        ref = reference_forward(q, t, params)

        out32 = jax.block_until_ready(model_f32(q, t))
        assert out32.shape == (B, 1)
        assert jnp.allclose(out32, ref, atol=1e-4, rtol=1e-4), f"f32 mismatch (B={B})"

        out16 = jax.block_until_ready(model_bf16(q, t))
        assert out16.shape == (B, 1)
        assert jnp.allclose(out16, ref, atol=3e-2, rtol=3e-2), f"bf16 mismatch (B={B})"

    print("KERNEL_OK")
</pallas_src>

<mosaic_0001>
module attributes {stable_mosaic.version = 11 : i64} {
  func.func @base_model_kernel(%arg0: i32, %arg1: memref<8x32xf32, #tpu.memory_space<vmem>>, %arg2: memref<8x48xf32, #tpu.memory_space<vmem>>, %arg3: memref<32x64xf32, #tpu.memory_space<vmem>>, %arg4: memref<48x64xf32, #tpu.memory_space<vmem>>, %arg5: memref<1x64xf32, #tpu.memory_space<vmem>>, %arg6: memref<64x64xf32, #tpu.memory_space<vmem>>, %arg7: memref<1x64xf32, #tpu.memory_space<vmem>>, %arg8: memref<64x64xf32, #tpu.memory_space<vmem>>, %arg9: memref<1x64xf32, #tpu.memory_space<vmem>>, %arg10: memref<64x32xf32, #tpu.memory_space<vmem>>, %arg11: memref<1x32xf32, #tpu.memory_space<vmem>>, %arg12: memref<1x32xf32, #tpu.memory_space<vmem>>, %arg13: memref<1x1xf32, #tpu.memory_space<smem>>, %arg14: memref<8x1xf32, #tpu.memory_space<vmem>>) attributes {dimension_semantics = [#tpu.dimension_semantics<parallel>], iteration_bounds = array<i64: 1>, scalar_prefetch = 0 : i64, scratch_operands = 0 : i64, tpu.core_type = #tpu.core_type<tc>, window_params = [{transform_indices = @transform_0, window_bounds = array<i64: 8, 32>}, {transform_indices = @transform_1, window_bounds = array<i64: 8, 48>}, {pipeline_mode = #tpu.pipeline_mode<synchronous>, transform_indices = @transform_2, window_bounds = array<i64: 32, 64>}, {pipeline_mode = #tpu.pipeline_mode<synchronous>, transform_indices = @transform_3, window_bounds = array<i64: 48, 64>}, {pipeline_mode = #tpu.pipeline_mode<synchronous>, transform_indices = @transform_4, window_bounds = array<i64: 1, 64>}, {pipeline_mode = #tpu.pipeline_mode<synchronous>, transform_indices = @transform_5, window_bounds = array<i64: 64, 64>}, {pipeline_mode = #tpu.pipeline_mode<synchronous>, transform_indices = @transform_6, window_bounds = array<i64: 1, 64>}, {pipeline_mode = #tpu.pipeline_mode<synchronous>, transform_indices = @transform_7, window_bounds = array<i64: 64, 64>}, {pipeline_mode = #tpu.pipeline_mode<synchronous>, transform_indices = @transform_8, window_bounds = array<i64: 1, 64>}, {pipeline_mode = #tpu.pipeline_mode<synchronous>, transform_indices = @transform_9, window_bounds = array<i64: 64, 32>}, {pipeline_mode = #tpu.pipeline_mode<synchronous>, transform_indices = @transform_10, window_bounds = array<i64: 1, 32>}, {pipeline_mode = #tpu.pipeline_mode<synchronous>, transform_indices = @transform_11, window_bounds = array<i64: 1, 32>}, {transform_indices = @transform_12, window_bounds = array<i64: 1, 1>}, {transform_indices = @transform_13, window_bounds = array<i64: 8, 1>}]} {
    %c0 = arith.constant 0 : index
    %c0_0 = arith.constant 0 : index
    %0 = vector.load %arg1[%c0, %c0_0] : memref<8x32xf32, #tpu.memory_space<vmem>>, vector<8x32xf32>
    %c0_1 = arith.constant 0 : index
    %c0_2 = arith.constant 0 : index
    %1 = vector.load %arg2[%c0_1, %c0_2] : memref<8x48xf32, #tpu.memory_space<vmem>>, vector<8x48xf32>
    %c0_3 = arith.constant 0 : index
    %c0_4 = arith.constant 0 : index
    %2 = vector.load %arg3[%c0_3, %c0_4] : memref<32x64xf32, #tpu.memory_space<vmem>>, vector<32x64xf32>
    %cst = arith.constant dense<0.000000e+00> : vector<8x64xf32>
    %3 = tpu.matmul %0, %2, %cst {dimension_numbers = #tpu.dot_dimension_numbers<[1], [0], [0], [1], [0, 0, 1, 1], [], []>} : vector<8x32xf32>, vector<32x64xf32>, vector<8x64xf32> -> vector<8x64xf32>
    %c0_5 = arith.constant 0 : index
    %c0_6 = arith.constant 0 : index
    %4 = vector.load %arg4[%c0_5, %c0_6] : memref<48x64xf32, #tpu.memory_space<vmem>>, vector<48x64xf32>
    %cst_7 = arith.constant dense<0.000000e+00> : vector<8x64xf32>
    %5 = tpu.matmul %1, %4, %cst_7 {dimension_numbers = #tpu.dot_dimension_numbers<[1], [0], [0], [1], [0, 0, 1, 1], [], []>} : vector<8x48xf32>, vector<48x64xf32>, vector<8x64xf32> -> vector<8x64xf32>
    %6 = arith.addf %3, %5 : vector<8x64xf32>
    %c0_8 = arith.constant 0 : index
    %c0_9 = arith.constant 0 : index
    %7 = vector.load %arg5[%c0_8, %c0_9] : memref<1x64xf32, #tpu.memory_space<vmem>>, vector<1x64xf32>
    %8 = vector.broadcast %7 : vector<1x64xf32> to vector<8x64xf32>
    %9 = arith.addf %6, %8 : vector<8x64xf32>
    %c0_10 = arith.constant 0 : index
    %c0_11 = arith.constant 0 : index
    %10 = vector.load %arg6[%c0_10, %c0_11] : memref<64x64xf32, #tpu.memory_space<vmem>>, vector<64x64xf32>
    %cst_12 = arith.constant dense<0.000000e+00> : vector<8x64xf32>
    %11 = tpu.matmul %9, %10, %cst_12 {dimension_numbers = #tpu.dot_dimension_numbers<[1], [0], [0], [1], [0, 0, 1, 1], [], []>} : vector<8x64xf32>, vector<64x64xf32>, vector<8x64xf32> -> vector<8x64xf32>
    %c0_13 = arith.constant 0 : index
    %c0_14 = arith.constant 0 : index
    %12 = vector.load %arg7[%c0_13, %c0_14] : memref<1x64xf32, #tpu.memory_space<vmem>>, vector<1x64xf32>
    %13 = vector.broadcast %12 : vector<1x64xf32> to vector<8x64xf32>
    %14 = arith.addf %11, %13 : vector<8x64xf32>
    %cst_15 = arith.constant 0.000000e+00 : f32
    %15 = vector.broadcast %cst_15 : f32 to vector<8x64xf32>
    %16 = arith.maximumf %14, %15 : vector<8x64xf32>
    %c0_16 = arith.constant 0 : index
    %c0_17 = arith.constant 0 : index
    %17 = vector.load %arg8[%c0_16, %c0_17] : memref<64x64xf32, #tpu.memory_space<vmem>>, vector<64x64xf32>
    %cst_18 = arith.constant dense<0.000000e+00> : vector<8x64xf32>
    %18 = tpu.matmul %16, %17, %cst_18 {dimension_numbers = #tpu.dot_dimension_numbers<[1], [0], [0], [1], [0, 0, 1, 1], [], []>} : vector<8x64xf32>, vector<64x64xf32>, vector<8x64xf32> -> vector<8x64xf32>
    %c0_19 = arith.constant 0 : index
    %c0_20 = arith.constant 0 : index
    %19 = vector.load %arg9[%c0_19, %c0_20] : memref<1x64xf32, #tpu.memory_space<vmem>>, vector<1x64xf32>
    %20 = vector.broadcast %19 : vector<1x64xf32> to vector<8x64xf32>
    %21 = arith.addf %18, %20 : vector<8x64xf32>
    %c0_21 = arith.constant 0 : index
    %c0_22 = arith.constant 0 : index
    %22 = vector.load %arg10[%c0_21, %c0_22] : memref<64x32xf32, #tpu.memory_space<vmem>>, vector<64x32xf32>
    %cst_23 = arith.constant dense<0.000000e+00> : vector<8x32xf32>
    %23 = tpu.matmul %21, %22, %cst_23 {dimension_numbers = #tpu.dot_dimension_numbers<[1], [0], [0], [1], [0, 0, 1, 1], [], []>} : vector<8x64xf32>, vector<64x32xf32>, vector<8x32xf32> -> vector<8x32xf32>
    %c0_24 = arith.constant 0 : index
    %c0_25 = arith.constant 0 : index
    %24 = vector.load %arg11[%c0_24, %c0_25] : memref<1x32xf32, #tpu.memory_space<vmem>>, vector<1x32xf32>
    %25 = vector.broadcast %24 : vector<1x32xf32> to vector<8x32xf32>
    %26 = arith.addf %23, %25 : vector<8x32xf32>
    %cst_26 = arith.constant 0.000000e+00 : f32
    %27 = vector.broadcast %cst_26 : f32 to vector<8x32xf32>
    %28 = arith.maximumf %26, %27 : vector<8x32xf32>
    %c0_27 = arith.constant 0 : index
    %c0_28 = arith.constant 0 : index
    %29 = vector.load %arg12[%c0_27, %c0_28] : memref<1x32xf32, #tpu.memory_space<vmem>>, vector<1x32xf32>
    %30 = vector.broadcast %29 : vector<1x32xf32> to vector<8x32xf32>
    %31 = arith.mulf %28, %30 : vector<8x32xf32>
    %cst_29 = arith.constant dense<0.000000e+00> : vector<8xf32>
    %32 = vector.multi_reduction <add>, %31, %cst_29 [1] : vector<8x32xf32> to vector<8xf32>
    %33 = vector.shape_cast %32 : vector<8xf32> to vector<8x1xf32>
    %c0_30 = arith.constant 0 : index
    %c0_31 = arith.constant 0 : index
    %34 = memref.load %arg13[%c0_30, %c0_31] : memref<1x1xf32, #tpu.memory_space<smem>>
    %35 = vector.broadcast %34 : f32 to vector<8x1xf32>
    %36 = arith.addf %33, %35 : vector<8x1xf32>
    %37 = arith.negf %36 : vector<8x1xf32>
    %38 = math.exp %37 : vector<8x1xf32>
    %cst_32 = arith.constant 1.000000e+00 : f32
    %39 = vector.broadcast %cst_32 : f32 to vector<8x1xf32>
    %40 = arith.addf %39, %38 : vector<8x1xf32>
    %41 = arith.divf %39, %40 : vector<8x1xf32>
    %c0_33 = arith.constant 0 : index
    %c0_34 = arith.constant 0 : index
    %42 = vector.load %arg14[%c0_33, %c0_34] : memref<8x1xf32, #tpu.memory_space<vmem>>, vector<8x1xf32>
    tpu.vector_store %arg14[%c0_33, %c0_34], %41 {strides = array<i32>} : memref<8x1xf32, #tpu.memory_space<vmem>>, vector<8x1xf32>,
    return
  }
  func.func @transform_0(%arg0: i32) -> (i32, i32) {
    %c0_i32 = arith.constant 0 : i32
    %c0_i32_0 = arith.constant 0 : i32
    return %arg0, %c0_i32 : i32, i32
  }
  func.func @transform_1(%arg0: i32) -> (i32, i32) {
    %c0_i32 = arith.constant 0 : i32
    %c0_i32_0 = arith.constant 0 : i32
    return %arg0, %c0_i32 : i32, i32
  }
  func.func @transform_2(%arg0: i32) -> (i32, i32) {
    %c0_i32 = arith.constant 0 : i32
    %c0_i32_0 = arith.constant 0 : i32
    %c0_i32_1 = arith.constant 0 : i32
    return %c0_i32, %c0_i32_0 : i32, i32
  }
  func.func @transform_3(%arg0: i32) -> (i32, i32) {
    %c0_i32 = arith.constant 0 : i32
    %c0_i32_0 = arith.constant 0 : i32
    %c0_i32_1 = arith.constant 0 : i32
    return %c0_i32, %c0_i32_0 : i32, i32
  }
  func.func @transform_4(%arg0: i32) -> (i32, i32) {
    %c0_i32 = arith.constant 0 : i32
    %c0_i32_0 = arith.constant 0 : i32
    %c0_i32_1 = arith.constant 0 : i32
    return %c0_i32, %c0_i32_0 : i32, i32
  }
  func.func @transform_5(%arg0: i32) -> (i32, i32) {
    %c0_i32 = arith.constant 0 : i32
    %c0_i32_0 = arith.constant 0 : i32
    %c0_i32_1 = arith.constant 0 : i32
    return %c0_i32, %c0_i32_0 : i32, i32
  }
  func.func @transform_6(%arg0: i32) -> (i32, i32) {
    %c0_i32 = arith.constant 0 : i32
    %c0_i32_0 = arith.constant 0 : i32
    %c0_i32_1 = arith.constant 0 : i32
    return %c0_i32, %c0_i32_0 : i32, i32
  }
  func.func @transform_7(%arg0: i32) -> (i32, i32) {
    %c0_i32 = arith.constant 0 : i32
    %c0_i32_0 = arith.constant 0 : i32
    %c0_i32_1 = arith.constant 0 : i32
    return %c0_i32, %c0_i32_0 : i32, i32
  }
  func.func @transform_8(%arg0: i32) -> (i32, i32) {
    %c0_i32 = arith.constant 0 : i32
    %c0_i32_0 = arith.constant 0 : i32
    %c0_i32_1 = arith.constant 0 : i32
    return %c0_i32, %c0_i32_0 : i32, i32
  }
  func.func @transform_9(%arg0: i32) -> (i32, i32) {
    %c0_i32 = arith.constant 0 : i32
    %c0_i32_0 = arith.constant 0 : i32
    %c0_i32_1 = arith.constant 0 : i32
    return %c0_i32, %c0_i32_0 : i32, i32
  }
  func.func @transform_10(%arg0: i32) -> (i32, i32) {
    %c0_i32 = arith.constant 0 : i32
    %c0_i32_0 = arith.constant 0 : i32
    %c0_i32_1 = arith.constant 0 : i32
    return %c0_i32, %c0_i32_0 : i32, i32
  }
  func.func @transform_11(%arg0: i32) -> (i32, i32) {
    %c0_i32 = arith.constant 0 : i32
    %c0_i32_0 = arith.constant 0 : i32
    %c0_i32_1 = arith.constant 0 : i32
    return %c0_i32, %c0_i32_0 : i32, i32
  }
  func.func @transform_12(%arg0: i32) -> (i32, i32) {
    %c0_i32 = arith.constant 0 : i32
    %c0_i32_0 = arith.constant 0 : i32
    %c0_i32_1 = arith.constant 0 : i32
    return %c0_i32, %c0_i32_0 : i32, i32
  }
  func.func @transform_13(%arg0: i32) -> (i32, i32) {
    %c0_i32 = arith.constant 0 : i32
    %c0_i32_0 = arith.constant 0 : i32
    return %arg0, %c0_i32 : i32, i32
  }
}

</mosaic_0001>

<bundles_post_ra>
// kernel: apply.1
= control target key start
LH: loop header
LB: loop body
LE: loop exit
PB: predicated region body
PF: predicated region fallthrough
CT: control target
= control target key end

     0   :  { %19 = vsyncpa [#allocation4], 0  ;;  %s1084_s0 = inlined_call_operand.hbm [shape: f32[8,32], index: 0, kind: input, shape index: {}]   ;;  %s1085_s1 = inlined_call_operand.hbm [shape: f32[8,48], index: 1, kind: input, shape index: {}]   ;;  %s1086_s2 = inlined_call_operand.hbm [shape: f32[32,64], index: 2, kind: input, shape index: {}]   ;;  %s1087_s3 = inlined_call_operand.hbm [shape: f32[48,64], index: 3, kind: input, shape index: {}]   ;;  %s1088_s4 = inlined_call_operand.vmem [shape: f32[1,64], index: 4, kind: input, shape index: {}]   ;;  %s1089_s5 = inlined_call_operand.hbm [shape: f32[64,64], index: 5, kind: input, shape index: {}]   ;;  %s1090_s6 = inlined_call_operand.vmem [shape: f32[1,64], index: 6, kind: input, shape index: {}]   ;;  %s1091_s7 = inlined_call_operand.hbm [shape: f32[64,64], index: 7, kind: input, shape index: {}]   ;;  %s1092_s8 = inlined_call_operand.vmem [shape: f32[1,64], index: 8, kind: input, shape index: {}]   ;;  %s1093_s9 = inlined_call_operand.hbm [shape: f32[64,32], index: 9, kind: input, shape index: {}]   ;;  %s1094_s10 = inlined_call_operand.vmem [shape: f32[1,32], index: 10, kind: input, shape index: {}]   ;;  %s1095_s11 = inlined_call_operand.vmem [shape: f32[1,32], index: 11, kind: input, shape index: {}]   ;;  %s1096_s12 = inlined_call_operand.<no memory space> [shape: f32[1,1], index: 12, kind: input, shape index: {}]   ;;  %s1097_s13 = inlined_call_operand.vmem [shape: f32[8,1], index: 13, kind: output, shape index: {}]  }
   0x1   :  { %20 = vsyncpa [#allocation6], 0 }
   0x2   :  { %21 = vsyncpa [#allocation9], 0 }
   0x3   :  { %22 = vsyncpa [#allocation12], 0  ;;  %s897_s25 = smov [#allocation5]  }
   0x4   :  { %s39_s26 = sshll.u32 %s897_s25, 4  ;;  %s40_s26 = int_to_ptr.vmem [resolvable:$true] %s39_s26 }
   0x5   :  { %s757_s27 = scalar_lea.vmem %s40_s26, 128  ;;  %p762_p1 = scmp.lt.s32.totalorder %s40_s26, %s40_s26 }
   0x6   :  { %p758_p0 = scmp.ne.s32.totalorder %s40_s26, %s757_s27  ;;  %p763_p2 = scmp.lt.s32.totalorder %s757_s27, %s757_s27 }
   0x8   :  { %p764_p3 = por %p763_p2, %p762_p1 }
   0xa   :  { %p765_p4 = pnand %p764_p3, %p758_p0 }
   0xc   :  { %768 = shalt.err (!%p765_p4)
}
   0xd   :  { %42 = dma.hbm_to_vmem [thread:$0]  %s1085_s1, 128, %s40_s26, [#allocation6]  }
   0xe   :  { %s898_s30 = smov [#allocation8]   ;;  %s899_s15 = smov [#allocation11]  }
   0xf   :  { %s60_s14 = sshll.u32 %s898_s30, 4  ;;  %s88_s16 = sshll.u32 %s899_s15, 4  ;;  %s61_s14 = int_to_ptr.vmem [resolvable:$true] %s60_s14  ;;  %s89_s16 = int_to_ptr.vmem [resolvable:$true] %s88_s16 }
  0x10   :  { %s777_s17 = scalar_lea.vmem %s61_s14, 768  ;;  %p782_p6 = scmp.lt.s32.totalorder %s61_s14, %s61_s14 }
  0x11   :  { %p778_p5 = scmp.ne.s32.totalorder %s61_s14, %s777_s17  ;;  %p783_p7 = scmp.lt.s32.totalorder %s777_s17, %s777_s17 }
  0x13   :  { %p784_p8 = por %p783_p7, %p782_p6 }
  0x15   :  { %p785_p9 = pnand %p784_p8, %p778_p5 }
  0x17   :  { %788 = shalt.err (!%p785_p9)
}
  0x18   :  { %s900_s18 = smov 128   ;;  %s901_s19 = smov 8  }
  0x19   :  { %66 = dma.hbm_to_vmem [thread:$0]  %s1087_s3, 768, %s61_s14, [#allocation9], %s900_s18, %s900_s18, %s901_s19  }
  0x1a   :  { %s797_s1 = scalar_lea.vmem %s89_s16, 1024  ;;  %p802_p11 = scmp.lt.s32.totalorder %s89_s16, %s89_s16 }
  0x1b   :  { %p798_p10 = scmp.ne.s32.totalorder %s89_s16, %s797_s1  ;;  %p803_p12 = scmp.lt.s32.totalorder %s797_s1, %s797_s1 }
  0x1d   :  { %p804_p13 = por %p803_p12, %p802_p11 }
  0x1f   :  { %p805_p0 = pnand %p804_p13, %p798_p10 }
  0x21   :  { %808 = shalt.err (!%p805_p0)
}
  0x22   :  { %94 = dma.hbm_to_vmem [thread:$0]  %s1091_s7, 1024, %s89_s16, [#allocation12], %s900_s18, %s900_s18, %s901_s19  }
  0x23   :  { %s902_s24 = smov [#allocation3]   ;;  %s903_s26 = smov [#allocation7]  }
  0x24   :  { %s29_s25 = sshll.u32 %s902_s24, 4  ;;  %s48_s3 = sshll.u32 %s903_s26, 4  ;;  %s30_s25 = int_to_ptr.vmem [resolvable:$true] %s29_s25  ;;  %s49_s3 = int_to_ptr.vmem [resolvable:$true] %s48_s3 }
  0x25   :  { %s817_s27 = scalar_lea.vmem %s30_s25, 128  ;;  %p822_p2 = scmp.lt.s32.totalorder %s30_s25, %s30_s25 }
  0x26   :  { %p818_p1 = scmp.ne.s32.totalorder %s30_s25, %s817_s27  ;;  %p823_p3 = scmp.lt.s32.totalorder %s817_s27, %s817_s27 }
  0x28   :  { %p824_p4 = por %p823_p3, %p822_p2 }
  0x2a   :  { %p825_p5 = pnand %p824_p4, %p818_p1 }
  0x2c   :  { %828 = shalt.err (!%p825_p5)
}
  0x2d   :  { %32 = dma.hbm_to_vmem [thread:$0]  %s1084_s0, 128, %s30_s25, [#allocation4]  }
  0x2e   :  { %s837_s30 = scalar_lea.vmem %s49_s3, 512  ;;  %p842_p7 = scmp.lt.s32.totalorder %s49_s3, %s49_s3 }
  0x2f   :  { %p838_p6 = scmp.ne.s32.totalorder %s49_s3, %s837_s30  ;;  %p843_p8 = scmp.lt.s32.totalorder %s837_s30, %s837_s30 }
  0x31   :  { %p844_p9 = por %p843_p8, %p842_p7 }
  0x33   :  { %p845_p10 = pnand %p844_p9, %p838_p6 }
  0x35   :  { %848 = shalt.err (!%p845_p10)
}
  0x36   :  { %54 = dma.hbm_to_vmem [thread:$0]  %s1086_s2, 512, %s49_s3, [#allocation6], %s900_s18, %s900_s18, %s901_s19  }
  0x37   :  { %s904_s15 = smov [#allocation10]   ;;  %s905_s17 = smov [#allocation13]  }
  0x38   :  { %s74_s16 = sshll.u32 %s904_s15, 4  ;;  %s102_s0 = sshll.u32 %s905_s17, 4  ;;  %s75_s16 = int_to_ptr.vmem [resolvable:$true] %s74_s16  ;;  %s103_s0 = int_to_ptr.vmem [resolvable:$true] %s102_s0 }
  0x39   :  { %s857_s20 = scalar_lea.vmem %s75_s16, 1024  ;;  %p862_p12 = scmp.lt.s32.totalorder %s75_s16, %s75_s16 }
  0x3a   :  { %p858_p11 = scmp.ne.s32.totalorder %s75_s16, %s857_s20  ;;  %p863_p13 = scmp.lt.s32.totalorder %s857_s20, %s857_s20 }
  0x3c   :  { %p864_p0 = por %p863_p13, %p862_p12 }
  0x3e   :  { %p865_p1 = pnand %p864_p0, %p858_p11 }
  0x40   :  { %868 = shalt.err (!%p865_p1)
}
  0x41   :  { %80 = dma.hbm_to_vmem [thread:$0]  %s1089_s5, 1024, %s75_s16, [#allocation9], %s900_s18, %s900_s18, %s901_s19  }
  0x42   :  { %s877_s2 = scalar_lea.vmem %s103_s0, 1024  ;;  %p882_p3 = scmp.lt.s32.totalorder %s103_s0, %s103_s0 }
  0x43   :  { %p878_p2 = scmp.ne.s32.totalorder %s103_s0, %s877_s2  ;;  %p883_p4 = scmp.lt.s32.totalorder %s877_s2, %s877_s2 }
  0x45   :  { %p884_p5 = por %p883_p4, %p882_p3 }
  0x47   :  { %p885_p6 = pnand %p884_p5, %p878_p2 }
  0x49   :  { %888 = shalt.err (!%p885_p6)
}
  0x4a   :  { %108 = dma.hbm_to_vmem [thread:$0]  %s1093_s9, 1024, %s103_s0, [#allocation12], %s900_s18, %s900_s18, %s901_s19  }
  0x4b   :  { %889 = dma.done.wait [#allocation4], 128  }
  0x4c   :  { %890 = vsyncadd [#allocation4], 4294967168 }
  0x4d   :  { %891 = dma.done.wait [#allocation6], 640  }
  0x4e   :  { %892 = vsyncadd [#allocation6], 4294966656 }
  0x4f   :  { %893 = dma.done.wait [#allocation9], 1792  }
  0x50   :  { %894 = vsyncadd [#allocation9], 4294965504 }
  0x51   :  { %895 = dma.done.wait [#allocation12], 2048  }
  0x52   :  { %896 = vsyncadd [#allocation12], 4294965248  ;;  %v906_v0 = vmov 0.0   ;;  %vm907_vm0 = vmmov 0   ;;  %v147_v1 = vld [vmem:[#allocation8 + $0x28] sm:$0xff]  ;;  %v146_v2 = vld [vmem:[#allocation8 + $0x20] sm:$0xff]  ;;  %v583_v61 = vstv %s1096_s12 }
  0x53   :  { %651 = vmatprep.subr.mxu0 %v906_v0  ;;  %663 = vmatprep.mubr.msk.f32.mxu0 %vm907_vm0, %v906_v0  ;;  %v145_v3 = vld [vmem:[#allocation8 + $0x18] sm:$0xff]  ;;  %v144_v4 = vld [vmem:[#allocation8 + $0x10] sm:$0xff]  ;;  %v311_v5 = vld [vmem:[#allocation10 + $0x38] sm:$0xff]  ;;  %vm148_vm1 = vcmask 392192   ;;  %vm222_vm2 = vcmask 261120   ;;  %vm319_vm3 = vcmask 523264  }
  0x54   :  { %677 = vmatprep.subr.mxu1 %v906_v0  ;;  %693 = vmatprep.mubr.msk.f32.mxu1 %vm907_vm0, %v906_v0  ;;  %v143_v6 = vld [vmem:[#allocation8 + $0x8] sm:$0xff]  ;;  %v142_v7 = vld [vmem:[#allocation8] sm:$0xff]  ;;  %v137_v8 = vld [vmem:[#allocation5] sm:$0xff]  ;;  %vm591_vm4 = vcmask 7168  }
  0x55   :  { %652 = vmatpush3.msra.mxu0 %v147_v1  ;;  %678 = vmatpush3.msra.mxu1 %v311_v5  ;;  %v141_v9 = vld [vmem:[#allocation7 + $0x18] sm:$0xff]  ;;  %v140_v10 = vld [vmem:[#allocation7 + $0x10] sm:$0xff]  ;;  %v139_v11 = vld [vmem:[#allocation7 + $0x8] sm:$0xff] }
  0x56   :  { %653 = vmatprep.subr.mxu0 %v906_v0  ;;  %679 = vmatprep.subr.mxu1 %v906_v0  ;;  %v138_v12 = vld [vmem:[#allocation7] sm:$0xff]  ;;  %v136_v13 = vld [vmem:[#allocation3] sm:$0xff]  ;;  %v309_v15 = vld [vmem:[#allocation10 + $0x28] sm:$0xff] }
  0x57   :  { %654 = vmatpush3.msra.mxu0 %v146_v2  ;;  %v310_v14 = vld [vmem:[#allocation10 + $0x30] sm:$0xff]  ;;  %v308_v16 = vld [vmem:[#allocation10 + $0x20] sm:$0xff]  ;;  %v307_v17 = vld [vmem:[#allocation10 + $0x18] sm:$0xff] }
  0x58   :  { %655 = vmatprep.subr.mxu0 %v906_v0  ;;  %680 = vmatpush3.msra.mxu1 %v310_v14  ;;  %v306_v18 = vld [vmem:[#allocation10 + $0x10] sm:$0xff]  ;;  %v305_v19 = vld [vmem:[#allocation10 + $0x8] sm:$0xff]  ;;  %v304_v20 = vld [vmem:[#allocation10] sm:$0xff] }
  0x59   :  { %656 = vmatpush3.msra.mxu0 %v145_v3  ;;  %681 = vmatprep.subr.mxu1 %v906_v0  ;;  %v401_v21 = vld [vmem:[#allocation11 + $0x38] sm:$0xff]  ;;  %v400_v22 = vld [vmem:[#allocation11 + $0x30] sm:$0xff]  ;;  %v399_v23 = vld [vmem:[#allocation11 + $0x28] sm:$0xff] }
  0x5a   :  { %657 = vmatprep.subr.mxu0 %v906_v0  ;;  %682 = vmatpush3.msra.mxu1 %v309_v15  ;;  %v398_v24 = vld [vmem:[#allocation11 + $0x20] sm:$0xff]  ;;  %v397_v25 = vld [vmem:[#allocation11 + $0x18] sm:$0xff]  ;;  %v396_v33 = vld [vmem:[#allocation11 + $0x10] sm:$0xff] }
  0x5b   :  { %658 = vmatpush3.msra.mxu0 %v144_v4  ;;  %683 = vmatprep.subr.mxu1 %v906_v0  ;;  %v603_v29 = vld [vmem:[%s1088_s4] ss:$0 sm:$0xff]  ;;  %v395_v34 = vld [vmem:[#allocation11 + $0x8] sm:$0xff]  ;;  %v489_v36 = vld [vmem:[#allocation13 + $0x38] sm:$0xff] }
  0x5c   :  { %659 = vmatprep.subr.mxu0 %v906_v0  ;;  %684 = vmatpush3.msra.mxu1 %v308_v16  ;;  %v394_v35 = vld [vmem:[#allocation11] sm:$0xff]  ;;  %v488_v37 = vld [vmem:[#allocation13 + $0x30] sm:$0xff]  ;;  %v487_v38 = vld [vmem:[#allocation13 + $0x28] sm:$0xff] }
  0x5d   :  { %660 = vmatpush3.msra.mxu0 %v143_v6  ;;  %685 = vmatprep.subr.mxu1 %v906_v0  ;;  %v486_v39 = vld [vmem:[#allocation13 + $0x20] sm:$0xff]  ;;  %v485_v40 = vld [vmem:[#allocation13 + $0x18] sm:$0xff]  ;;  %v484_v41 = vld [vmem:[#allocation13 + $0x10] sm:$0xff] }
  0x5e   :  { %661 = vmatprep.subr.mxu0 %v906_v0  ;;  %686 = vmatpush3.msra.mxu1 %v307_v17  ;;  %v604_v42 = vld [vmem:[%s1090_s6] ss:$0 sm:$0xff]  ;;  %v483_v47 = vld [vmem:[#allocation13 + $0x8] sm:$0xff] }
  0x5f   :  { %662 = vmatpush3.msra.mxu0 %v142_v7  ;;  %687 = vmatprep.subr.mxu1 %v906_v0  ;;  %v482_v48 = vld [vmem:[#allocation13] sm:$0xff] }
  0x60   :  { %664 = vmatmul.mubr.msk.f32.vlgmr.msra.gmra.mxu0 %vm148_vm1, %v137_v8  ;;  %666 = vmatprep.subr.mxu0 %v906_v0  ;;  %v606_v49 = vld [vmem:[%s1092_s8] ss:$0 sm:$0xff] }
  0x61   :  { %667 = vmatpush3.msra.mxu0 %v141_v9  ;;  %674 = vmatprep.mubr.msk.f32.mxu0 %vm907_vm0, %v906_v0  ;;  %v608_v53 = vld [vmem:[%s1094_s10] ss:$0 sm:$0xff] }
  0x62   :  { %668 = vmatprep.subr.mxu0 %v906_v0  ;;  %688 = vmatpush3.msra.mxu1 %v306_v18  ;;  %v610_v57 = vld [vmem:[%s1095_s11] ss:$0 sm:$0xff] }
  0x63   :  { %669 = vmatpush3.msra.mxu0 %v140_v10  ;;  %689 = vmatprep.subr.mxu1 %v906_v0 }
  0x64   :  { %670 = vmatprep.subr.mxu0 %v906_v0  ;;  %690 = vmatpush3.msra.mxu1 %v305_v19 }
  0x65   :  { %671 = vmatpush3.msra.mxu0 %v139_v11  ;;  %691 = vmatprep.subr.mxu1 %v906_v0 }
  0x66   :  { %672 = vmatprep.subr.mxu0 %v906_v0  ;;  %692 = vmatpush3.msra.mxu1 %v304_v20 }
  0x67   :  { %673 = vmatpush3.msra.mxu0 %v138_v12  ;;  %715 = vmatprep.subr.mxu1 %v906_v0 }
  0x68   :  { %675 = vmatmul.mubr.msk.f32.vlgmr.msra.gmra.mxu0 %vm222_vm2, %v136_v13  ;;  %696 = vmatprep.subr.mxu0 %v906_v0 }
  0x69   :  { %712 = vmatprep.mubr.msk.f32.mxu0 %vm907_vm0, %v906_v0  ;;  %697 = vmatpush3.msra.mxu0 %v401_v21 }
  0x6a   :  { %698 = vmatprep.subr.mxu0 %v906_v0 }
  0x6b   :  { %699 = vmatpush3.msra.mxu0 %v400_v22 }
  0x6c   :  { %700 = vmatprep.subr.mxu0 %v906_v0 }
  0x6d   :  { %701 = vmatpush3.msra.mxu0 %v399_v23 }
  0x6e   :  { %702 = vmatprep.subr.mxu0 %v906_v0 }
  0x6f   :  { %703 = vmatpush3.msra.mxu0 %v398_v24 }
  0x70   :  { %704 = vmatprep.subr.mxu0 %v906_v0 }
  0x71   :  { %705 = vmatpush3.msra.mxu0 %v397_v25 }
  0x72   :  { %706 = vmatprep.subr.mxu0 %v906_v0 }
  0x73   :  { %707 = vmatpush3.msra.mxu0 %v396_v33 }
  0x74   :  { %708 = vmatprep.subr.mxu0 %v906_v0 }
  0x75   :  { %709 = vmatpush3.msra.mxu0 %v395_v34 }
  0x76   :  { %710 = vmatprep.subr.mxu0 %v906_v0 }
  0x77   :  { %711 = vmatpush3.msra.mxu0 %v394_v35 }
 0x120   :  { %v218_v26 = vpop.f32.mrf.mxu0 }
 0x122   :  { %v665_v27 = vpop.f32.mrf.mxu0 }
 0x128   :  { %v292_v28 = vpop.f32.mrf.mxu0 }
 0x129   :  { %v293_v30 = vadd.f32 %v292_v28, %v218_v26 }
 0x12a   :  { %v676_v31 = vpop.f32.mrf.mxu0 }
 0x12b   :  { %v303_v32 = vadd.f32 %v603_v29, %v293_v30 }
 0x12d   :  { %694 = vmatmul.mubr.msk.f32.vlgmr.msra.gmra.mxu1 %vm319_vm3, %v303_v32 }
 0x12e   :  { %731 = vmatprep.mubr.msk.f32.mxu1 %vm907_vm0, %v906_v0  ;;  %716 = vmatpush3.msra.mxu1 %v489_v36 }
 0x12f   :  { %717 = vmatprep.subr.mxu1 %v906_v0 }
 0x130   :  { %718 = vmatpush3.msra.mxu1 %v488_v37 }
 0x131   :  { %719 = vmatprep.subr.mxu1 %v906_v0 }
 0x132   :  { %720 = vmatpush3.msra.mxu1 %v487_v38 }
 0x133   :  { %721 = vmatprep.subr.mxu1 %v906_v0 }
 0x134   :  { %722 = vmatpush3.msra.mxu1 %v486_v39 }
 0x135   :  { %723 = vmatprep.subr.mxu1 %v906_v0 }
 0x136   :  { %724 = vmatpush3.msra.mxu1 %v485_v40 }
 0x137   :  { %725 = vmatprep.subr.mxu1 %v906_v0 }
 0x138   :  { %726 = vmatpush3.msra.mxu1 %v484_v41 }
 0x139   :  { %727 = vmatprep.subr.mxu1 %v906_v0 }
 0x13a   :  { %728 = vmatpush3.msra.mxu1 %v483_v47 }
 0x13b   :  { %729 = vmatprep.subr.mxu1 %v906_v0 }
 0x13c   :  { %730 = vmatpush3.msra.mxu1 %v482_v48 }
 0x1ed   :  { %v389_v43 = vpop.f32.mrf.mxu1 }
 0x1ee   :  { %v390_v44 = vadd.f32 %v604_v42, %v389_v43 }
 0x1ef   :  { %v695_v45 = vpop.f32.mrf.mxu1 }
 0x1f0   :  { %v393_v46 = vmax.f32 %v390_v44, 0.0 }
 0x1f2   :  { %713 = vmatmul.mubr.msk.f32.vlgmr.msra.gmra.mxu0 %vm319_vm3, %v393_v46 }
 0x2b2   :  { %v478_v50 = vpop.f32.mrf.mxu0 }
 0x2b3   :  { %v479_v51 = vadd.f32 %v606_v49, %v478_v50 }
 0x2b4   :  { %v714_v52 = vpop.f32.mrf.mxu0 }
 0x2b5   :  { %732 = vmatmul.mubr.msk.f32.vlgmr.msra.gmra.mxu1 %vm319_vm3, %v479_v51 }
 0x375   :  { %v566_v54 = vpop.f32.mrf.mxu1 }
 0x376   :  { %v567_v55 = vadd.f32 %v608_v53, %v566_v54 }
 0x377   :  { %v733_v56 = vpop.f32.mrf.mxu1 }
 0x378   :  { %v570_v58 = vmax.f32 %v567_v55, 0.0 }
 0x37a   :  { %v578_v59 = vmul.f32 %v610_v57, %v570_v58 }
 0x37c   :  { %v579_v60 = vsel %vm222_vm2, %v578_v59, 0.0 }
 0x37d   :  { %580 = vadd.xlane.f32.xlu0 %v579_v60 }
 0x406   :  { %v581_v62 = vpop.xlane.xlu0 %580 }
 0x407   :  { %v584_v63 = vadd.f32 %v583_v61, %v581_v62 }
 0x409   :  { %v611_v0 = vmul.f32 -1.442695, %v584_v63 }
 0x40b   :  { %745 = vpow2.f32 %v611_v0 }
 0x418   :  { %v746_v1 = vpop.eup %745 }
 0x419   :  { %v588_v2 = vadd.f32 1.0, %v746_v1 }
 0x41b   :  { %747 = vrcp.f32 %v588_v2 }
 0x428   :  { %v748_v3 = vpop.eup %747 }
 0x429   :  { %592 = vst.msk [vmem:[%s1097_s13] sm:$0xff] %vm591_vm4, %v748_v3 }
 0x42a   :  { %597 = vsyncpa [#allocation4], 1 }
 0x42b   :  { %598 = vsyncpa [#allocation6], 1 }
 0x42c   :  { %599 = vsyncpa [#allocation9], 1 }
 0x42d   :  { %600 = vsyncpa [#allocation12], 1 }

</bundles_post_ra>
